<compile_context>
chip_gen: v7x
topology: tpu7x:2x2x1
jax: 0.10.0
libtpu: 0.0.40
codegen_flags: <defaults>
</compile_context>

<pallas_src>
import jax
import jax.numpy as jnp
from jax.experimental import pallas as pl
from jax.experimental.pallas import tpu as pltpu


# ---------------------------------------------------------------------------
# Pallas kernel: tiled HBM -> VMEM -> HBM copy.
# ---------------------------------------------------------------------------
def _copy_kernel(x_ref, o_ref):
    o_ref[...] = x_ref[...]


def _round_up(a: int, b: int) -> int:
    return ((a + b - 1) // b) * b


def _round_down(a: int, b: int) -> int:
    return (a // b) * b


_TILE_BYTES = 4 * 1024 * 1024        # per-buffer VMEM budget (dtype independent)
_VMEM_LIMIT = 32 * 1024 * 1024       # 4 double-buffered 4 MiB tiles + headroom
_LANE_CANDIDATES = (2048, 1024, 512, 256, 128)   # lane-dense widths (x128)


def identity_copy(x: jax.Array) -> jax.Array:
    """Identity that materializes a fresh output via a tiled, pipelined copy."""
    orig_shape = x.shape
    total = int(x.size)
    if total == 0:
        return x
    itemsize = x.dtype.itemsize

    # Widest lane-dense last dim that exactly divides the flat size (no pad).
    lanes = next((c for c in _LANE_CANDIDATES if total % c == 0), 0)

    if lanes == 0:
        # Rare non-128-divisible size: single full-array block, no pad/slice.
        # TODO(synk): add a masked-tail tiled path for *large* unaligned arrays.
        out = pl.pallas_call(
            _copy_kernel,
            out_shape=jax.ShapeDtypeStruct((1, total), x.dtype),
        )(x.reshape(1, total))
        return out.reshape(orig_shape)

    rows = total // lanes
    sublane = max(8, 32 // itemsize)          # 8 f32 / 16 bf16 / 32 int8

    # Tile rows from a byte budget, rounded to the dtype's sublane packing.
    budget_rows = max(sublane,
                      _round_down(_TILE_BYTES // (lanes * itemsize), sublane))
    tile_rows = min(budget_rows, rows)
    if tile_rows >= rows and rows >= 2 * sublane:
        # Guarantee >= 2 parallel blocks so both v7x TensorCores participate.
        tile_rows = _round_up(pl.cdiv(rows, 2), sublane)
    grid = (pl.cdiv(rows, tile_rows),)

    out2d = pl.pallas_call(
        _copy_kernel,
        out_shape=jax.ShapeDtypeStruct((rows, lanes), x.dtype),
        grid=grid,
        in_specs=[pl.BlockSpec((tile_rows, lanes), lambda i: (i, 0))],
        out_specs=pl.BlockSpec((tile_rows, lanes), lambda i: (i, 0)),
        compiler_params=pltpu.CompilerParams(
            dimension_semantics=("parallel",),
            vmem_limit_bytes=_VMEM_LIMIT,
        ),
        cost_estimate=pl.CostEstimate(
            flops=0,
            transcendentals=0,
            bytes_accessed=2 * total * itemsize,
        ),
    )(x.reshape(rows, lanes))
    return out2d.reshape(orig_shape)


# ---------------------------------------------------------------------------
# Module wrapper (mirrors the PyTorch IdentityFirstStage API).
# Hot path is a zero-cost `return x` — no kernel launch, no hidden copies.
# ---------------------------------------------------------------------------
class IdentityFirstStage:
    """JAX port of the PyTorch IdentityFirstStage module (pure identity)."""

    def __init__(self, *args, vq_interface: bool = False, **kwargs):
        self.vq_interface = vq_interface
        # No parameters (the torch module has none).

    def encode(self, x, *args, **kwargs):
        return x

    def decode(self, x, *args, **kwargs):
        return x

    def quantize(self, x, *args, **kwargs):
        if self.vq_interface:
            return x, None, [None, None, None]
        return x

    def forward(self, x, *args, **kwargs):
        return x

    __call__ = forward


if __name__ == "__main__":
    key = jax.random.PRNGKey(0)
    # NCHW input consistent with a first-stage autoencoder: batch=2, channels=4,
    # spatial 16x16.
    x = jax.random.normal(key, (2, 4, 16, 16), dtype=jnp.float32)

    # Hot path: pure identity (zero HBM traffic, zero launches).
    model = IdentityFirstStage(vq_interface=False)
    y = jax.block_until_ready(model(x))
    assert y.shape == x.shape and y.dtype == x.dtype
    assert bool(jnp.array_equal(y, x))

    # vq_interface path.
    model_vq = IdentityFirstStage(vq_interface=True)
    q, emb_loss, info = model_vq.quantize(x)
    q = jax.block_until_ready(q)
    assert bool(jnp.array_equal(q, x)) and emb_loss is None and info == [None, None, None]

    # Pallas tiled-copy kernel: small lane-dense case (single block).
    y_small = jax.block_until_ready(identity_copy(x))
    assert bool(jnp.array_equal(y_small, x))

    # Larger case (4 MiB f32) -> exercises the >=2-block parallel grid.
    x_big = jax.random.normal(jax.random.PRNGKey(1), (8, 32, 64, 64), dtype=jnp.float32)
    y_big = jax.block_until_ready(identity_copy(x_big))
    assert bool(jnp.array_equal(y_big, x_big))

    # bf16 case -> dtype-aware sublane packing (16) and byte-sized tiles.
    x_bf16 = x.astype(jnp.bfloat16)
    y_bf16 = jax.block_until_ready(identity_copy(x_bf16))
    assert bool(jnp.array_equal(y_bf16, x_bf16))

    # Non-128-divisible size -> single full-array block fallback (no pad/slice).
    x_odd = jax.random.normal(jax.random.PRNGKey(2), (3, 5, 7), dtype=jnp.float32)
    y_odd = jax.block_until_ready(identity_copy(x_odd))
    assert bool(jnp.array_equal(y_odd, x_odd))

    print("KERNEL_OK")
</pallas_src>

<mosaic_0001>
module attributes {stable_mosaic.version = 11 : i64} {
  func.func @_copy_kernel(%arg0: i32, %arg1: memref<1x2048xf32, #tpu.memory_space<vmem>>, %arg2: memref<1x2048xf32, #tpu.memory_space<vmem>>) attributes {dimension_semantics = [#tpu.dimension_semantics<parallel>], iteration_bounds = array<i64: 1>, scalar_prefetch = 0 : i64, scratch_operands = 0 : i64, tpu.core_type = #tpu.core_type<tc>, window_params = [{transform_indices = @transform_0, window_bounds = array<i64: 1, 2048>}, {transform_indices = @transform_1, window_bounds = array<i64: 1, 2048>}]} {
    %c0 = arith.constant 0 : index
    %c0_0 = arith.constant 0 : index
    %0 = vector.load %arg1[%c0, %c0_0] : memref<1x2048xf32, #tpu.memory_space<vmem>>, vector<1x2048xf32>
    %c0_1 = arith.constant 0 : index
    %c0_2 = arith.constant 0 : index
    %1 = vector.load %arg2[%c0_1, %c0_2] : memref<1x2048xf32, #tpu.memory_space<vmem>>, vector<1x2048xf32>
    tpu.vector_store %arg2[%c0_1, %c0_2], %0 {strides = array<i32>} : memref<1x2048xf32, #tpu.memory_space<vmem>>, vector<1x2048xf32>,
    return
  }
  func.func @transform_0(%arg0: i32) -> (i32, i32) {
    %c0_i32 = arith.constant 0 : i32
    %c0_i32_0 = arith.constant 0 : i32
    return %arg0, %c0_i32 : i32, i32
  }
  func.func @transform_1(%arg0: i32) -> (i32, i32) {
    %c0_i32 = arith.constant 0 : i32
    %c0_i32_0 = arith.constant 0 : i32
    return %arg0, %c0_i32 : i32, i32
  }
}

</mosaic_0001>

<bundles_post_ra>
// kernel: tpu_custom_call.1
= control target key start
LH: loop header
LB: loop body
LE: loop exit
PB: predicated region body
PF: predicated region fallthrough
CT: control target
= control target key end

     0   :  { %6 = vsyncpa [#allocation3], 0  ;;  %s126_s0 = inlined_call_operand.hbm [shape: f32[1,2048], index: 0, kind: input, shape index: {}]   ;;  %s127_s1 = inlined_call_operand.hbm [shape: f32[1,2048], index: 1, kind: output, shape index: {}]  }
   0x1   :  { %7 = vsyncpa [#allocation4], 0  ;;  %s90_s6 = smov [#allocation2]   ;;  %s42_s10 = scalar_lea.hbm %s126_s0, 256 }
   0x2   :  { %s14_s7 = sshll.u32 %s90_s6, 4  ;;  %p43_p0 = scmp.ne.s32.totalorder %s126_s0, %s42_s10  ;;  %s15_s7 = int_to_ptr.vmem [resolvable:$true] %s14_s7 }
   0x3   :  { %p46_p1 = scmp.lt.u32.totalorder %s42_s10, %s126_s0 }
   0x5   :  { %p48_p2 = pnand %p46_p1, %p43_p0 }
   0x7   :  { %51 = shalt.err (!%p48_p2)
}
   0x8   :  { %s52_s15 = scalar_lea.vmem %s15_s7, 256  ;;  %p57_p4 = scmp.lt.s32.totalorder %s15_s7, %s15_s7 }
   0x9   :  { %p53_p3 = scmp.ne.s32.totalorder %s15_s7, %s52_s15  ;;  %p58_p5 = scmp.lt.s32.totalorder %s52_s15, %s52_s15 }
   0xb   :  { %p59_p6 = por %p58_p5, %p57_p4 }
   0xd   :  { %p60_p7 = pnand %p59_p6, %p53_p3 }
   0xf   :  { %63 = shalt.err (!%p60_p7)
}
  0x10   :  { %17 = dma.hbm_to_vmem [thread:$0]  %s126_s0, 256, %s15_s7, [#allocation3]  }
  0x11   :  { %86 = dma.done.wait [#allocation3], 256  }
  0x12   :  { %87 = vsyncadd [#allocation3], 4294967040  ;;  %s91_s18 = smov [#allocation5]   ;;  %v21_v0 = vld [vmem:[#allocation2] sm:$0xff]  ;;  %v22_v1 = vld [vmem:[#allocation2 + $0x8] sm:$0xff] }
  0x13   :  { %s31_s19 = sshll.u32 %s91_s18, 4  ;;  %23 = vst [vmem:[#allocation5] sm:$0xff] %v21_v0  ;;  %24 = vst [vmem:[#allocation5 + $0x8] sm:$0xff] %v22_v1  ;;  %s32_s19 = int_to_ptr.vmem [resolvable:$true] %s31_s19 }
  0x14   :  { %s64_s20 = scalar_lea.vmem %s32_s19, 256  ;;  %p69_p9 = scmp.lt.s32.totalorder %s32_s19, %s32_s19 }
  0x15   :  { %p65_p8 = scmp.ne.s32.totalorder %s32_s19, %s64_s20  ;;  %p70_p10 = scmp.lt.s32.totalorder %s64_s20, %s64_s20 }
  0x17   :  { %p71_p11 = por %p70_p10, %p69_p9 }
  0x19   :  { %p72_p12 = pnand %p71_p11, %p65_p8 }
  0x1b   :  { %75 = shalt.err (!%p72_p12)
}
  0x1c   :  { %s76_s0 = scalar_lea.hbm %s127_s1, 256 }
  0x1d   :  { %p77_p13 = scmp.ne.s32.totalorder %s127_s1, %s76_s0  ;;  %p80_p0 = scmp.lt.u32.totalorder %s76_s0, %s127_s1 }
  0x1f   :  { %p82_p1 = pnand %p80_p0, %p77_p13 }
  0x21   :  { %85 = shalt.err (!%p82_p1)
}
  0x22   :  { %34 = dma.vmem_to_hbm [thread:$0]  %s32_s19, 256, %s127_s1, [#allocation4]  }
  0x23   :  { %88 = dma.done.wait [#allocation4], 256  }
  0x24   :  { %89 = vsyncadd [#allocation4], 4294967040 }
  0x25   :  { %38 = vsyncpa [#allocation3], 1 }
  0x26   :  { %39 = vsyncpa [#allocation4], 1 }

</bundles_post_ra>
